<compile_context>
chip_gen: v5e
topology: v5e:2x2
jax: 0.10.0
libtpu: 0.0.40
codegen_flags: <defaults>
</compile_context>

<pallas_src>
import jax
import jax.numpy as jnp
import numpy as np
from jax import lax
from jax.experimental import pallas as pl
from jax.experimental.pallas import tpu as pltpu

# ---------------- model hyper-parameters (small, consistent with module) ----
B = 2            # batch
N = 8            # sequence length (n_timesteps)
EMB = 32         # embedding dim
HIDDEN = 16      # per-head hidden dim
HEADS = 4        # number of heads
FF_MULT = 4      # ff_hidden_mult
LOCAL_CONTEXT = 3
LN_EPS = 1e-5

BN = B * N                 # 16  fused (batch*seq) rows
HH = HEADS * HIDDEN        # 64  head-concatenated hidden
HBN = HEADS * BN           # 64  head-blocked score columns
FFH = FF_MULT * EMB        # 128 feed-forward hidden


def _layer_norm(x, gamma, beta, eps=LN_EPS):
    mu = jnp.mean(x, axis=-1, keepdims=True)
    var = jnp.mean((x - mu) ** 2, axis=-1, keepdims=True)
    return (x - mu) * lax.rsqrt(var + eps) * gamma + beta


def sparse_block_kernel(x_ref, wqkv_ref, wu_ref, w1_ref, w2_ref,
                        const_ref, vec_ref, o_ref):
    x = x_ref[...]                                   # (BN, EMB) f32

    # ---- static slices of the packed small operands (off the critical path) -
    b1  = vec_ref[0:1, :]                            # (1, FFH)
    bu  = vec_ref[1:2, 0:EMB]
    g1  = vec_ref[2:3, 0:EMB]
    be1 = vec_ref[3:4, 0:EMB]
    b2  = vec_ref[4:5, 0:EMB]
    g2  = vec_ref[5:6, 0:EMB]
    be2 = vec_ref[6:7, 0:EMB]

    # host-precomputed constants: block-diagonal head selector + additive mask
    sel  = const_ref[0:HBN, 0:HH]                    # (HBN, HH)
    bias = const_ref[HBN:HBN + BN, 0:HBN]            # (BN, HBN)

    # ---- fused QKV projection (bf16 weights, f32 accumulate) ----------------
    x_bf = x.astype(jnp.bfloat16)
    qkv = jnp.dot(x_bf, wqkv_ref[...],
                  preferred_element_type=jnp.float32)        # (BN, 3*HH)
    q = qkv[:, 0:HH]
    k = qkv[:, HH:2 * HH]
    v = qkv[:, 2 * HH:3 * HH]

    # block-diagonal (over heads) packing of K and V (selector is a constant)
    k_bd = jnp.tile(k, (HEADS, 1)) * sel             # (HBN, HH)
    v_bd = jnp.tile(v, (HEADS, 1)) * sel             # (HBN, HH)

    # scores[m, h*BN + r] = q_h[m] . k_h[r] / HIDDEN   (+ additive sparse mask)
    scale = 1.0 / float(HIDDEN)
    scores = lax.dot_general(q, k_bd, (((1,), (1,)), ((), ())),
                             preferred_element_type=jnp.float32) * scale + bias

    # ---- softmax with normalization reassociated after the PV matmul --------
    m = jnp.max(scores, axis=-1, keepdims=True)
    e = jnp.exp(scores - m)                          # (BN, HBN) f32
    # two independent matmuls off the same LHS; normalize after, not before
    y = jnp.dot(e, v_bd, preferred_element_type=jnp.float32)     # (BN, HH)
    denom = jnp.dot(e, sel, preferred_element_type=jnp.float32)  # (BN, HH)
    denom = jnp.maximum(denom, 1e-30)                # guard vs. all-underflow block
    att = y * pl.reciprocal(denom, approx=True)      # (BN, HH), head-concatenated

    # ---- unify heads: Linear(heads*hidden, emb) with bias --------------------
    att = jnp.dot(att.astype(jnp.bfloat16), wu_ref[...],
                  preferred_element_type=jnp.float32) + bu

    # ---- residual + LayerNorm 1 ----------------------------------------------
    x1 = _layer_norm(att + x, g1, be1)

    # ---- feed-forward: Linear -> ReLU -> Linear -------------------------------
    h1 = jnp.dot(x1.astype(jnp.bfloat16), w1_ref[...],
                 preferred_element_type=jnp.float32) + b1
    h1 = jnp.maximum(h1, 0.0)
    ffo = jnp.dot(h1.astype(jnp.bfloat16), w2_ref[...],
                  preferred_element_type=jnp.float32) + b2

    # ---- residual + LayerNorm 2 ----------------------------------------------
    o_ref[...] = _layer_norm(ffo + x1, g2, be2).astype(o_ref.dtype)


# ---------------- host-side constant / parameter packing --------------------
def build_constants(bs, n):
    """Packed (HBN+BN, max(HH,HBN)) f32 slab: rows 0:HBN = sel, rows HBN: = mask bias."""
    bn = bs * n
    hbn = HEADS * bn
    # block-diagonal head selector sel[r, c] = 1 iff r//bn == c//HIDDEN
    rr = np.arange(hbn)[:, None]
    cc = np.arange(HH)[None, :]
    sel = ((rr // bn) == (cc // HIDDEN)).astype(np.float32)
    # additive mask: union of 'strided' and 'local' causal masks + cross-batch block
    r = np.arange(bn)[:, None]
    c = np.arange(hbn)[None, :]
    q_b, q_i = r // n, r % n
    k_b, k_j = (c % bn) // n, c % n
    diff = q_i - k_j
    allowed = ((q_b == k_b) & (diff >= 0) &
               ((diff <= LOCAL_CONTEXT) | (diff % LOCAL_CONTEXT == 0)))
    bias = np.where(allowed, 0.0, -1e30).astype(np.float32)
    w = max(HH, hbn)
    slab = np.zeros((hbn + bn, w), np.float32)
    slab[:hbn, :HH] = sel
    slab[hbn:, :hbn] = bias
    return jnp.asarray(slab)


def init_raw_params(key):
    ks = jax.random.split(key, 9)
    s = 0.1
    wq = jax.random.normal(ks[0], (EMB, HH), jnp.float32) * s
    wk = jax.random.normal(ks[1], (EMB, HH), jnp.float32) * s
    wv = jax.random.normal(ks[2], (EMB, HH), jnp.float32) * s
    wu = jax.random.normal(ks[3], (HH, EMB), jnp.float32) * s
    bu = jax.random.normal(ks[4], (1, EMB), jnp.float32) * s
    g1 = jnp.ones((1, EMB), jnp.float32)
    be1 = jnp.zeros((1, EMB), jnp.float32)
    w1 = jax.random.normal(ks[5], (EMB, FFH), jnp.float32) * s
    b1 = jax.random.normal(ks[6], (1, FFH), jnp.float32) * s
    w2 = jax.random.normal(ks[7], (FFH, EMB), jnp.float32) * s
    b2 = jax.random.normal(ks[8], (1, EMB), jnp.float32) * s
    g2 = jnp.ones((1, EMB), jnp.float32)
    be2 = jnp.zeros((1, EMB), jnp.float32)
    return (wq, wk, wv, wu, bu, g1, be1, w1, b1, w2, b2, g2, be2)


def pack_params(raw):
    (wq, wk, wv, wu, bu, g1, be1, w1, b1, w2, b2, g2, be2) = raw
    # bf16 weights in HBM (halves weight DMA; accuracy within default-precision rounding)
    wqkv = jnp.concatenate([wq, wk, wv], axis=1).astype(jnp.bfloat16)  # (EMB, 3*HH)
    wu_bf = wu.astype(jnp.bfloat16)
    w1_bf = w1.astype(jnp.bfloat16)
    w2_bf = w2.astype(jnp.bfloat16)
    # one (8, FFH) f32 slab for all small per-channel vectors
    vec = np.zeros((8, FFH), np.float32)
    vec[0, :] = np.asarray(b1)[0]
    for i, p in enumerate((bu, g1, be1, b2, g2, be2)):
        vec[i + 1, :EMB] = np.asarray(p)[0]
    consts = build_constants(B, N)
    return (wqkv, wu_bf, w1_bf, w2_bf, consts, jnp.asarray(vec))


def sparse_block(x, packed_params):
    """x: (B, N, EMB) float32. packed_params: (wqkv, wu, w1, w2, consts, vecs)."""
    wqkv, wu, w1, w2, consts, vecs = packed_params
    bs, n, emb = x.shape
    x2 = x.reshape(bs * n, emb)          # fold batch into rows (contiguous, free)

    vmem = pl.BlockSpec(memory_space=pltpu.MemorySpace.VMEM)
    out = pl.pallas_call(
        sparse_block_kernel,
        out_shape=jax.ShapeDtypeStruct((bs * n, emb), jnp.float32),
        in_specs=[vmem] * 7,
        out_specs=vmem,
    )(x2, wqkv, wu, w1, w2, consts, vecs)
    return out.reshape(bs, n, emb)


# ---------------- pure-JAX reference (correctness check) --------------------
def sparse_block_ref(x, raw):
    (wq, wk, wv, wu, bu, g1, be1, w1, b1, w2, b2, g2, be2) = raw
    bs, n, emb = x.shape
    q = (x @ wq).reshape(bs, n, HEADS, HIDDEN)
    k = (x @ wk).reshape(bs, n, HEADS, HIDDEN)
    v = (x @ wv).reshape(bs, n, HEADS, HIDDEN)
    q = jnp.transpose(q, (0, 2, 1, 3)) / HIDDEN ** 0.5
    k = jnp.transpose(k, (0, 2, 1, 3)) / HIDDEN ** 0.5
    v = jnp.transpose(v, (0, 2, 1, 3))
    dot = jnp.einsum("bhqd,bhkd->bhqk", q, k)
    ii = np.arange(n)[:, None]
    jj = np.arange(n)[None, :]
    diff = ii - jj
    mask = (diff >= 0) & ((diff <= LOCAL_CONTEXT) | (diff % LOCAL_CONTEXT == 0))
    dot = jnp.where(mask[None, None], dot, -jnp.inf)
    p = jax.nn.softmax(dot, axis=-1)
    out = jnp.einsum("bhqk,bhkd->bhqd", p, v)
    out = jnp.transpose(out, (0, 2, 1, 3)).reshape(bs, n, HH)
    att = out @ wu + bu
    x1 = _layer_norm(att + x, g1, be1)
    ff = jnp.maximum(x1 @ w1 + b1, 0.0) @ w2 + b2
    return _layer_norm(ff + x1, g2, be2)


if __name__ == "__main__":
    key = jax.random.PRNGKey(0)
    kx, kp = jax.random.split(key)
    x = jax.random.normal(kx, (B, N, EMB), jnp.float32)
    raw = init_raw_params(kp)
    packed = pack_params(raw)

    out = sparse_block(x, packed)
    jax.block_until_ready(out)

    # Reference at highest precision; kernel uses bf16-weight MXU passes and an
    # approx reciprocal, so ~1e-2 tolerance reflects rounding, not a bug.
    with jax.default_matmul_precision("highest"):
        ref = sparse_block_ref(x, raw)
    ref = jax.block_until_ready(ref)

    np.testing.assert_allclose(np.asarray(out), np.asarray(ref),
                               rtol=2e-2, atol=2e-2)
    print("KERNEL_OK")
</pallas_src>

<mosaic_0001>
module attributes {stable_mosaic.version = 11 : i64} {
  func.func @sparse_block_kernel(%arg0: memref<16x32xf32, #tpu.memory_space<vmem>>, %arg1: memref<32x192xbf16, #tpu.memory_space<vmem>>, %arg2: memref<64x32xbf16, #tpu.memory_space<vmem>>, %arg3: memref<32x128xbf16, #tpu.memory_space<vmem>>, %arg4: memref<128x32xbf16, #tpu.memory_space<vmem>>, %arg5: memref<80x64xf32, #tpu.memory_space<vmem>>, %arg6: memref<8x128xf32, #tpu.memory_space<vmem>>, %arg7: memref<16x32xf32, #tpu.memory_space<vmem>>) attributes {dimension_semantics = [], scalar_prefetch = 0 : i64, scratch_operands = 0 : i64, tpu.core_type = #tpu.core_type<tc>} {
    %c0 = arith.constant 0 : index
    %c0_0 = arith.constant 0 : index
    %0 = vector.load %arg0[%c0, %c0_0] : memref<16x32xf32, #tpu.memory_space<vmem>>, vector<16x32xf32>
    %c0_1 = arith.constant 0 : index
    %c0_2 = arith.constant 0 : index
    %1 = vector.load %arg6[%c0_1, %c0_2] : memref<8x128xf32, #tpu.memory_space<vmem>>, vector<1x128xf32>
    %c1 = arith.constant 1 : index
    %c0_3 = arith.constant 0 : index
    %2 = vector.load %arg6[%c1, %c0_3] : memref<8x128xf32, #tpu.memory_space<vmem>>, vector<1x32xf32>
    %c2 = arith.constant 2 : index
    %c0_4 = arith.constant 0 : index
    %3 = vector.load %arg6[%c2, %c0_4] : memref<8x128xf32, #tpu.memory_space<vmem>>, vector<1x32xf32>
    %c3 = arith.constant 3 : index
    %c0_5 = arith.constant 0 : index
    %4 = vector.load %arg6[%c3, %c0_5] : memref<8x128xf32, #tpu.memory_space<vmem>>, vector<1x32xf32>
    %c4 = arith.constant 4 : index
    %c0_6 = arith.constant 0 : index
    %5 = vector.load %arg6[%c4, %c0_6] : memref<8x128xf32, #tpu.memory_space<vmem>>, vector<1x32xf32>
    %c5 = arith.constant 5 : index
    %c0_7 = arith.constant 0 : index
    %6 = vector.load %arg6[%c5, %c0_7] : memref<8x128xf32, #tpu.memory_space<vmem>>, vector<1x32xf32>
    %c6 = arith.constant 6 : index
    %c0_8 = arith.constant 0 : index
    %7 = vector.load %arg6[%c6, %c0_8] : memref<8x128xf32, #tpu.memory_space<vmem>>, vector<1x32xf32>
    %c0_9 = arith.constant 0 : index
    %c0_10 = arith.constant 0 : index
    %8 = vector.load %arg5[%c0_9, %c0_10] : memref<80x64xf32, #tpu.memory_space<vmem>>, vector<64x64xf32>
    %c64 = arith.constant 64 : index
    %c0_11 = arith.constant 0 : index
    %9 = vector.load %arg5[%c64, %c0_11] : memref<80x64xf32, #tpu.memory_space<vmem>>, vector<16x64xf32>
    %10 = arith.truncf %0 : vector<16x32xf32> to vector<16x32xbf16>
    %c0_12 = arith.constant 0 : index
    %c0_13 = arith.constant 0 : index
    %11 = vector.load %arg1[%c0_12, %c0_13] : memref<32x192xbf16, #tpu.memory_space<vmem>>, vector<32x192xbf16>
    %cst = arith.constant dense<0.000000e+00> : vector<16x192xf32>
    %12 = tpu.matmul %10, %11, %cst {dimension_numbers = #tpu.dot_dimension_numbers<[1], [0], [0], [1], [0, 0, 1, 1], [], []>} : vector<16x32xbf16>, vector<32x192xbf16>, vector<16x192xf32> -> vector<16x192xf32>
    %13 = vector.extract_strided_slice %12 {offsets = [0, 0], sizes = [16, 64], strides = [1, 1]} : vector<16x192xf32> to vector<16x64xf32>
    %14 = vector.extract_strided_slice %12 {offsets = [0, 64], sizes = [16, 64], strides = [1, 1]} : vector<16x192xf32> to vector<16x64xf32>
    %15 = vector.extract_strided_slice %12 {offsets = [0, 128], sizes = [16, 64], strides = [1, 1]} : vector<16x192xf32> to vector<16x64xf32>
    %16 = tpu.concatenate %14, %14, %14, %14 in 0 : vector<16x64xf32>, vector<16x64xf32>, vector<16x64xf32>, vector<16x64xf32> -> vector<64x64xf32>
    %17 = arith.mulf %16, %8 : vector<64x64xf32>
    %18 = tpu.concatenate %15, %15, %15, %15 in 0 : vector<16x64xf32>, vector<16x64xf32>, vector<16x64xf32>, vector<16x64xf32> -> vector<64x64xf32>
    %19 = arith.mulf %18, %8 : vector<64x64xf32>
    %cst_14 = arith.constant dense<0.000000e+00> : vector<16x64xf32>
    %20 = tpu.matmul %13, %17, %cst_14 {dimension_numbers = #tpu.dot_dimension_numbers<[1], [1], [0], [0], [0, 0, 1, 0], [], []>} : vector<16x64xf32>, vector<64x64xf32>, vector<16x64xf32> -> vector<16x64xf32>
    %cst_15 = arith.constant 6.250000e-02 : f32
    %21 = vector.broadcast %cst_15 : f32 to vector<16x64xf32>
    %22 = arith.mulf %20, %21 : vector<16x64xf32>
    %23 = arith.addf %22, %9 : vector<16x64xf32>
    %cst_16 = arith.constant dense<0xFF800000> : vector<16xf32>
    %24 = vector.multi_reduction <maximumf>, %23, %cst_16 [1] : vector<16x64xf32> to vector<16xf32>
    %25 = vector.shape_cast %24 : vector<16xf32> to vector<16x1xf32>
    %26 = vector.broadcast %25 : vector<16x1xf32> to vector<16x64xf32>
    %27 = arith.subf %23, %26 : vector<16x64xf32>
    %28 = math.exp %27 : vector<16x64xf32>
    %cst_17 = arith.constant dense<0.000000e+00> : vector<16x64xf32>
    %29 = tpu.matmul %28, %19, %cst_17 {dimension_numbers = #tpu.dot_dimension_numbers<[1], [0], [0], [1], [0, 0, 1, 1], [], []>} : vector<16x64xf32>, vector<64x64xf32>, vector<16x64xf32> -> vector<16x64xf32>
    %cst_18 = arith.constant dense<0.000000e+00> : vector<16x64xf32>
    %30 = tpu.matmul %28, %8, %cst_18 {dimension_numbers = #tpu.dot_dimension_numbers<[1], [0], [0], [1], [0, 0, 1, 1], [], []>} : vector<16x64xf32>, vector<64x64xf32>, vector<16x64xf32> -> vector<16x64xf32>
    %cst_19 = arith.constant 1.000000e-30 : f32
    %31 = vector.broadcast %cst_19 : f32 to vector<16x64xf32>
    %32 = arith.maximumf %30, %31 : vector<16x64xf32>
    %33 = tpu.reciprocal %32 {approx = true} : vector<16x64xf32> -> vector<16x64xf32>
    %34 = arith.mulf %29, %33 : vector<16x64xf32>
    %35 = arith.truncf %34 : vector<16x64xf32> to vector<16x64xbf16>
    %c0_20 = arith.constant 0 : index
    %c0_21 = arith.constant 0 : index
    %36 = vector.load %arg2[%c0_20, %c0_21] : memref<64x32xbf16, #tpu.memory_space<vmem>>, vector<64x32xbf16>
    %cst_22 = arith.constant dense<0.000000e+00> : vector<16x32xf32>
    %37 = tpu.matmul %35, %36, %cst_22 {dimension_numbers = #tpu.dot_dimension_numbers<[1], [0], [0], [1], [0, 0, 1, 1], [], []>} : vector<16x64xbf16>, vector<64x32xbf16>, vector<16x32xf32> -> vector<16x32xf32>
    %38 = vector.broadcast %2 : vector<1x32xf32> to vector<16x32xf32>
    %39 = arith.addf %37, %38 : vector<16x32xf32>
    %40 = arith.addf %39, %0 : vector<16x32xf32>
    %cst_23 = arith.constant dense<0.000000e+00> : vector<16xf32>
    %41 = vector.multi_reduction <add>, %40, %cst_23 [1] : vector<16x32xf32> to vector<16xf32>
    %42 = vector.shape_cast %41 : vector<16xf32> to vector<16x1xf32>
    %cst_24 = arith.constant 3.200000e+01 : f32
    %43 = vector.broadcast %cst_24 : f32 to vector<16x1xf32>
    %44 = arith.divf %42, %43 : vector<16x1xf32>
    %45 = vector.broadcast %44 : vector<16x1xf32> to vector<16x32xf32>
    %46 = arith.subf %40, %45 : vector<16x32xf32>
    %47 = arith.mulf %46, %46 : vector<16x32xf32>
    %cst_25 = arith.constant dense<0.000000e+00> : vector<16xf32>
    %48 = vector.multi_reduction <add>, %47, %cst_25 [1] : vector<16x32xf32> to vector<16xf32>
    %49 = vector.shape_cast %48 : vector<16xf32> to vector<16x1xf32>
    %cst_26 = arith.constant 3.200000e+01 : f32
    %50 = vector.broadcast %cst_26 : f32 to vector<16x1xf32>
    %51 = arith.divf %49, %50 : vector<16x1xf32>
    %52 = vector.broadcast %44 : vector<16x1xf32> to vector<16x32xf32>
    %53 = arith.subf %40, %52 : vector<16x32xf32>
    %cst_27 = arith.constant 9.99999974E-6 : f32
    %54 = vector.broadcast %cst_27 : f32 to vector<16x1xf32>
    %55 = arith.addf %51, %54 : vector<16x1xf32>
    %56 = math.rsqrt %55 : vector<16x1xf32>
    %57 = vector.broadcast %56 : vector<16x1xf32> to vector<16x32xf32>
    %58 = arith.mulf %53, %57 : vector<16x32xf32>
    %59 = vector.broadcast %3 : vector<1x32xf32> to vector<16x32xf32>
    %60 = arith.mulf %58, %59 : vector<16x32xf32>
    %61 = vector.broadcast %4 : vector<1x32xf32> to vector<16x32xf32>
    %62 = arith.addf %60, %61 : vector<16x32xf32>
    %63 = arith.truncf %62 : vector<16x32xf32> to vector<16x32xbf16>
    %c0_28 = arith.constant 0 : index
    %c0_29 = arith.constant 0 : index
    %64 = vector.load %arg3[%c0_28, %c0_29] : memref<32x128xbf16, #tpu.memory_space<vmem>>, vector<32x128xbf16>
    %cst_30 = arith.constant dense<0.000000e+00> : vector<16x128xf32>
    %65 = tpu.matmul %63, %64, %cst_30 {dimension_numbers = #tpu.dot_dimension_numbers<[1], [0], [0], [1], [0, 0, 1, 1], [], []>} : vector<16x32xbf16>, vector<32x128xbf16>, vector<16x128xf32> -> vector<16x128xf32>
    %66 = vector.broadcast %1 : vector<1x128xf32> to vector<16x128xf32>
    %67 = arith.addf %65, %66 : vector<16x128xf32>
    %cst_31 = arith.constant 0.000000e+00 : f32
    %68 = vector.broadcast %cst_31 : f32 to vector<16x128xf32>
    %69 = arith.maximumf %67, %68 : vector<16x128xf32>
    %70 = arith.truncf %69 : vector<16x128xf32> to vector<16x128xbf16>
    %c0_32 = arith.constant 0 : index
    %c0_33 = arith.constant 0 : index
    %71 = vector.load %arg4[%c0_32, %c0_33] : memref<128x32xbf16, #tpu.memory_space<vmem>>, vector<128x32xbf16>
    %cst_34 = arith.constant dense<0.000000e+00> : vector<16x32xf32>
    %72 = tpu.matmul %70, %71, %cst_34 {dimension_numbers = #tpu.dot_dimension_numbers<[1], [0], [0], [1], [0, 0, 1, 1], [], []>} : vector<16x128xbf16>, vector<128x32xbf16>, vector<16x32xf32> -> vector<16x32xf32>
    %73 = vector.broadcast %5 : vector<1x32xf32> to vector<16x32xf32>
    %74 = arith.addf %72, %73 : vector<16x32xf32>
    %75 = arith.addf %74, %62 : vector<16x32xf32>
    %cst_35 = arith.constant dense<0.000000e+00> : vector<16xf32>
    %76 = vector.multi_reduction <add>, %75, %cst_35 [1] : vector<16x32xf32> to vector<16xf32>
    %77 = vector.shape_cast %76 : vector<16xf32> to vector<16x1xf32>
    %cst_36 = arith.constant 3.200000e+01 : f32
    %78 = vector.broadcast %cst_36 : f32 to vector<16x1xf32>
    %79 = arith.divf %77, %78 : vector<16x1xf32>
    %80 = vector.broadcast %79 : vector<16x1xf32> to vector<16x32xf32>
    %81 = arith.subf %75, %80 : vector<16x32xf32>
    %82 = arith.mulf %81, %81 : vector<16x32xf32>
    %cst_37 = arith.constant dense<0.000000e+00> : vector<16xf32>
    %83 = vector.multi_reduction <add>, %82, %cst_37 [1] : vector<16x32xf32> to vector<16xf32>
    %84 = vector.shape_cast %83 : vector<16xf32> to vector<16x1xf32>
    %cst_38 = arith.constant 3.200000e+01 : f32
    %85 = vector.broadcast %cst_38 : f32 to vector<16x1xf32>
    %86 = arith.divf %84, %85 : vector<16x1xf32>
    %87 = vector.broadcast %79 : vector<16x1xf32> to vector<16x32xf32>
    %88 = arith.subf %75, %87 : vector<16x32xf32>
    %cst_39 = arith.constant 9.99999974E-6 : f32
    %89 = vector.broadcast %cst_39 : f32 to vector<16x1xf32>
    %90 = arith.addf %86, %89 : vector<16x1xf32>
    %91 = math.rsqrt %90 : vector<16x1xf32>
    %92 = vector.broadcast %91 : vector<16x1xf32> to vector<16x32xf32>
    %93 = arith.mulf %88, %92 : vector<16x32xf32>
    %94 = vector.broadcast %6 : vector<1x32xf32> to vector<16x32xf32>
    %95 = arith.mulf %93, %94 : vector<16x32xf32>
    %96 = vector.broadcast %7 : vector<1x32xf32> to vector<16x32xf32>
    %97 = arith.addf %95, %96 : vector<16x32xf32>
    %c0_40 = arith.constant 0 : index
    %c0_41 = arith.constant 0 : index
    %98 = vector.load %arg7[%c0_40, %c0_41] : memref<16x32xf32, #tpu.memory_space<vmem>>, vector<16x32xf32>
    tpu.vector_store %arg7[%c0_40, %c0_41], %97 {strides = array<i32>} : memref<16x32xf32, #tpu.memory_space<vmem>>, vector<16x32xf32>,
    return
  }
}

</mosaic_0001>

<bundles_post_ra>
// kernel: tpu_custom_call.1
= control target key start
LH: loop header
LB: loop body
LE: loop exit
PB: predicated region body
PF: predicated region fallthrough
CT: control target
= control target key end

     0   :  { %s759_s30 = smov 64   ;;  %s1034_s0 = inlined_call_operand.vmem [shape: f32[16,32], index: 0, kind: input, shape index: {}]   ;;  %s1035_s1 = inlined_call_operand.vmem [shape: bf16[32,192], index: 1, kind: input, shape index: {}]   ;;  %s1036_s2 = inlined_call_operand.vmem [shape: bf16[64,32], index: 2, kind: input, shape index: {}]   ;;  %s1037_s3 = inlined_call_operand.vmem [shape: bf16[32,128], index: 3, kind: input, shape index: {}]   ;;  %s1038_s4 = inlined_call_operand.vmem [shape: bf16[128,32], index: 4, kind: input, shape index: {}]   ;;  %s1039_s5 = inlined_call_operand.vmem [shape: f32[80,64], index: 5, kind: input, shape index: {}]   ;;  %s1040_s6 = inlined_call_operand.vmem [shape: f32[8,128], index: 6, kind: input, shape index: {}]   ;;  %s1041_s7 = inlined_call_operand.hbm [shape: f32[16,32], index: 7, kind: output, shape index: {}]  }
   0x1   :  { %v605_v0 = vld [vmem:[%s1035_s1 + $0x10] sm:$0xf]  ;;  %v688_v1 = vld [vmem:[%s1035_s1 + $0x14] sm:$0xf0]  ;;  %v813_v2 = vld [vmem:[%s1039_s5 + $0x28] sm:$0xff] }
   0x2   :  { %v606_v3 = vor.u32 %v688_v1, %v605_v0  ;;  %122 = vrot.lane.b32.xlu1 %v813_v2, %s759_s30  ;;  %v597_v4 = vld [vmem:[%s1035_s1] sm:$0xf]  ;;  %v686_v5 = vld [vmem:[%s1035_s1 + $0x4] sm:$0xf0]  ;;  %v826_v6 = vld [vmem:[%s1039_s5 + $0x38] sm:$0xff] }
   0x3   :  { %v598_v7 = vor.u32 %v686_v5, %v597_v4  ;;  %v831_v8 = vld [vmem:[%s1034_s0] sm:$0xff]  ;;  %v836_v9 = vld [vmem:[%s1034_s0 + $0x8] sm:$0xff]  ;;  %126 = vrot.lane.b32.xlu0 %v826_v6, %s759_s30  ;;  %v848_v11 = vld [vmem:[%s1039_s5 + $0x18] sm:$0xff] }
   0x4   :  { %82 = vmatpush.bf16.msra.mxu0 %v606_v3  ;;  %v843_v10 = vld [vmem:[%s1039_s5 + $0x20] sm:$0xff]  ;;  %118 = vrot.lane.b32.xlu2 %v848_v11, %s759_s30  ;;  %v47_v12 = vpack.c.bf16 %v836_v9, %v831_v8 }
   0x5   :  { %12 = vsyncpa [#allocation3], 0  ;;  %vm72_vm0 = vcmask 261120   ;;  %v857_v13 = vld [vmem:[%s1039_s5 + $0x30] sm:$0xff]  ;;  %v874_v15 = vld [vmem:[%s1039_s5] sm:$0xff]  ;;  %vm176_vm1 = vcmask 523264  }
   0x6   :  { %v865_v14 = vld [vmem:[%s1039_s5 + $0x10] sm:$0xff]  ;;  %v879_v16 = vld [vmem:[%s1039_s5 + $0x8] sm:$0xff]  ;;  %v607_v39 = vld [vmem:[%s1035_s1 + $0x18] sm:$0xf0]  ;;  %s761_s27 = smov [#allocation2]   ;;  %s583_s9 = sshll.u32 %s1041_s7, 4  ;;  %s584_s9 = int_to_ptr.hbm [resolvable:$true] %s583_s9 }
   0x7   :  { %v687_v38 = vld [vmem:[%s1035_s1 + $0x14] sm:$0xf]  ;;  %v685_v40 = vld [vmem:[%s1035_s1 + $0x4] sm:$0xf]  ;;  %v599_v42 = vld [vmem:[%s1035_s1 + $0x8] sm:$0xf0] }
   0x8   :  { %83 = vmatpush.bf16.msra.mxu0 %v598_v7  ;;  %v610_v41 = vor.u32 %v687_v38, %v607_v39  ;;  %v602_v43 = vor.u32 %v685_v40, %v599_v42  ;;  %v45_v58 = vld [vmem:[%s1039_s5 + $0x40] sm:$0xff]  ;;  %v46_v0 = vld [vmem:[%s1039_s5 + $0x48] sm:$0xff]  ;;  %v760_v39 = vmov 32.0   ;;  %s581_s28 = sshll.u32 %s761_s27, 4  ;;  %s582_s28 = int_to_ptr.vmem [resolvable:$true] %s581_s28 }
   0xa   :  { %120 = vrot.lane.b32.xlu1 %v843_v10, %s759_s30  ;;  %96 = vmatpush.bf16.msra.mxu1 %v610_v41 }
   0xb   :  { %611 = vmatmul.msk.bf16.vlgmr.msra.gmra.mxu0 %vm72_vm0, %v47_v12  ;;  %124 = vrot.lane.b32.xlu0 %v857_v13, %s759_s30 }
   0xc   :  { %116 = vrot.lane.b32.xlu2 %v865_v14, %s759_s30 }
   0xe   :  { %97 = vmatpush.bf16.msra.mxu1 %v602_v43 }
  0x11   :  { %612 = vmatmul.msk.bf16.vlgmr.msra.gmra.mxu1 %vm72_vm0, %v47_v12 }
  0x12   :  { %112 = vrot.lane.b32.xlu1 %v874_v15, %s759_s30  ;;  %275 = vmatpush.msrb.mxu1 %v826_v6 }
  0x13   :  { %114 = vrot.lane.b32.xlu0 %v879_v16, %s759_s30 }
  0x14   :  { %276 = vmatpush.msrb.mxu1 %v857_v13 }
  0x16   :  { %277 = vmatpush.msrb.mxu1 %v813_v2 }
  0x18   :  { %278 = vmatpush.msrb.mxu1 %v843_v10 }
  0x1a   :  { %279 = vmatpush.msrb.mxu1 %v848_v11 }
  0x1c   :  { %280 = vmatpush.msrb.mxu1 %v865_v14 }
  0x1e   :  { %281 = vmatpush.msrb.mxu1 %v879_v16 }
  0x20   :  { %282 = vmatpush.msrb.mxu1 %v874_v15 }
  0x5e   :  { %v119_v22 = vpop.permute.xlu2 %118 }
  0x66   :  { %v117_v28 = vpop.permute.xlu2 %116 }
  0x74   :  { %v123_v18 = vpop.permute.xlu1 %122 }
  0x75   :  { %v127_v17 = vpop.permute.xlu0 %126 }
  0x7c   :  { %v121_v23 = vpop.permute.xlu1 %120 }
  0x7d   :  { %v125_v19 = vpop.permute.xlu0 %124 }
  0x84   :  { %v113_v29 = vpop.permute.xlu1 %112 }
  0x85   :  { %v115_v33 = vpop.permute.xlu0 %114 }
  0x88   :  { %v85_v20 = vpop.f32.mrf.mxu0 }
  0x89   :  { %v142_v21 = vmul.f32 %v125_v19, %v85_v20  ;;  %v140_v30 = vmul.f32 %v121_v23, %v85_v20  ;;  %v138_v31 = vmul.f32 %v117_v28, %v85_v20  ;;  %v136_v32 = vmul.f32 %v113_v29, %v85_v20 }
  0x8b   :  { %172 = vrot.lane.b32.xlu0 %v142_v21, %s759_s30 }
  0x8e   :  { %v99_v49 = vpop.f32.mrf.mxu1 }
  0x8f   :  { %v150_v52 = vmul.f32 %v99_v49, %v857_v13  ;;  %v148_v54 = vmul.f32 %v99_v49, %v843_v10  ;;  %v146_v56 = vmul.f32 %v99_v49, %v865_v14  ;;  %v144_v62 = vmul.f32 %v99_v49, %v874_v15  ;;  %v692_v15 = vld [vmem:[%s1036_s2 + $0x18] sm:$0xff] }
  0x90   :  { %v87_v24 = vpop.f32.mrf.mxu0  ;;  %337 = vmatpush.bf16.msra.mxu1 %v692_v15 }
  0x91   :  { %v143_v25 = vmul.f32 %v127_v17, %v87_v24  ;;  %v141_v26 = vmul.f32 %v123_v18, %v87_v24  ;;  %v139_v27 = vmul.f32 %v119_v22, %v87_v24  ;;  %v137_v34 = vmul.f32 %v115_v33, %v87_v24  ;;  %v690_v17 = vld [vmem:[%s1036_s2 + $0x8] sm:$0xff]  ;;  %v689_v18 = vld [vmem:[%s1036_s2] sm:$0xff] }
  0x93   :  { %174 = vrot.lane.b32.xlu2 %v143_v25, %s759_s30  ;;  %170 = vrot.lane.b32.xlu1 %v141_v26, %s759_s30 }
  0x94   :  { %166 = vrot.lane.b32.xlu0 %v139_v27, %s759_s30 }
  0x96   :  { %v101_v50 = vpop.f32.mrf.mxu1 }
  0x97   :  { %v151_v51 = vmul.f32 %v101_v50, %v826_v6  ;;  %v149_v53 = vmul.f32 %v101_v50, %v813_v2  ;;  %v147_v55 = vmul.f32 %v101_v50, %v848_v11  ;;  %v145_v60 = vmul.f32 %v101_v50, %v879_v16  ;;  %v691_v16 = vld [vmem:[%s1036_s2 + $0x10] sm:$0xff] }
  0x98   :  { %338 = vmatpush.bf16.msra.mxu1 %v691_v16 }
  0x99   :  { %252 = vmatpush.msra.mxu3 %v151_v51 }
  0x9b   :  { %168 = vrot.lane.b32.xlu2 %v140_v30, %s759_s30  ;;  %164 = vrot.lane.b32.xlu1 %v138_v31, %s759_s30  ;;  %v708_v30 = vld [vmem:[%s1040_s6 + $0x1] ss:$0 sm:$0xff] }
  0x9c   :  { %160 = vrot.lane.b32.xlu0 %v136_v32, %s759_s30  ;;  %253 = vmatpush.msra.mxu3 %v150_v52 }
  0x9d   :  { %339 = vmatpush.bf16.msra.mxu1 %v690_v17  ;;  %v709_v17 = vld [vmem:[%s1040_s6 + $0x2] ss:$0 sm:$0xff] }
  0x9e   :  { %254 = vmatpush.msra.mxu3 %v149_v53 }
  0xa0   :  { %255 = vmatpush.msra.mxu3 %v148_v54  ;;  %v694_v54 = vld [vmem:[%s1037_s3 + $0x8] sm:$0xff] }
  0xa1   :  { %340 = vmatpush.bf16.msra.mxu1 %v689_v18 }
  0xa2   :  { %256 = vmatpush.msra.mxu3 %v147_v55 }
  0xa3   :  { %162 = vrot.lane.b32.xlu2 %v137_v34, %s759_s30 }
  0xa4   :  { %257 = vmatpush.msra.mxu3 %v146_v56 }
  0xa6   :  { %258 = vmatpush.msra.mxu3 %v145_v60 }
  0xa8   :  { %259 = vmatpush.msra.mxu3 %v144_v62  ;;  %v701_v62 = vld [vmem:[%s1038_s4 + $0x30] sm:$0xff] }
  0xaa   :  { %433 = vmatpush.bf16.msrb.mxu3 %v694_v54 }
  0xed   :  { %v175_v35 = vpop.permute.xlu2 %174 }
  0xee   :  { %613 = vmatpush.xpose.msk.msra.mxu2 %vm176_vm1, %v175_v35 }
  0xf5   :  { %v169_v44 = vpop.permute.xlu2 %168 }
  0xfd   :  { %v173_v36 = vpop.permute.xlu0 %172  ;;  %v163_v47 = vpop.permute.xlu2 %162 }
  0xfe   :  { %614 = vmatpush.xpose.msk.msra.mxu2 %vm176_vm1, %v173_v36 }
 0x105   :  { %v171_v37 = vpop.permute.xlu1 %170 }
 0x106   :  { %615 = vmatpush.xpose.msk.msra.mxu2 %vm176_vm1, %v171_v37  ;;  %v167_v45 = vpop.permute.xlu0 %166 }
 0x10a   :  { %616 = vmatpush.xpose.msk.msra.mxu2 %vm176_vm1, %v169_v44 }
 0x10d   :  { %v165_v46 = vpop.permute.xlu1 %164 }
 0x10e   :  { %617 = vmatpush.xpose.msk.msra.mxu2 %vm176_vm1, %v167_v45  ;;  %v161_v48 = vpop.permute.xlu0 %160 }
 0x112   :  { %618 = vmatpush.xpose.msk.msra.mxu2 %vm176_vm1, %v165_v46 }
 0x116   :  { %619 = vmatpush.xpose.msk.msra.mxu2 %vm176_vm1, %v163_v47 }
 0x11a   :  { %620 = vmatpush.xpose.msk.msra.mxu2 %vm176_vm1, %v161_v48 }
 0x11d   :  { %621 = vmatmul.msk.f32.vlgmr.msra.gmra.mxu2 %vm176_vm1, %v85_v20 }
 0x125   :  { %622 = vmatmul.msk.f32.gmra.mxu2 %vm176_vm1, %v87_v24 }
 0x1a0   :  { %v216_v57 = vpop.f32.mrf.mxu2 }
 0x1a1   :  { %v222_v59 = vmul.f32 0.0625, %v216_v57  ;;  %v693_v57 = vld [vmem:[%s1037_s3] sm:$0xff]  ;;  %s763_s3 = smov 8  }
 0x1a2   :  { %434 = vmatpush.bf16.msrb.mxu3 %v693_v57 }
 0x1a3   :  { %v224_v61 = vadd.f32 %v222_v59, %v45_v58  ;;  %v702_v59 = vld [vmem:[%s1038_s4 + $0x38] sm:$0xff] }
 0x1a4   :  { %509 = vmatpush.bf16.msrb.mxu0 %v702_v59 }
 0x1a5   :  { %v226_v63 = vsel %vm176_vm1, %v224_v61, -inf }
 0x1a6   :  { %227 = vmax.xlane.f32.xlu1 %v226_v63 }
 0x1a8   :  { %v219_v1 = vpop.f32.mrf.mxu2  ;;  %510 = vmatpush.bf16.msrb.mxu0 %v701_v62 }
 0x1a9   :  { %v223_v2 = vmul.f32 0.0625, %v219_v1 }
 0x1ab   :  { %v225_v3 = vadd.f32 %v223_v2, %v46_v0  ;;  %v700_v2 = vld [vmem:[%s1038_s4 + $0x28] sm:$0xff] }
 0x1ac   :  { %511 = vmatpush.bf16.msrb.mxu0 %v700_v2 }
 0x1ad   :  { %v229_v4 = vsel %vm176_vm1, %v225_v3, -inf }
 0x1ae   :  { %230 = vmax.xlane.f32.xlu2 %v229_v4 }
 0x219   :  { %v228_v5 = vpop.xlane.xlu1 %227 }
 0x21a   :  { %v232_v6 = vsub.f32 %v224_v61, %v228_v5  ;;  %v699_v5 = vld [vmem:[%s1038_s4 + $0x20] sm:$0xff] }
 0x21b   :  { %512 = vmatpush.bf16.msrb.mxu0 %v699_v5 }
 0x21c   :  { %v234_v7 = vmul.f32 1.442695, %v232_v6 }
 0x21e   :  { %715 = vpow2.f32 %v234_v7 }
 0x221   :  { %v231_v10 = vpop.xlane.xlu2 %230 }
 0x222   :  { %v233_v11 = vsub.f32 %v225_v3, %v231_v10 }
 0x224   :  { %v716_v12 = vpop.eup %715  ;;  %v236_v13 = vmul.f32 1.442695, %v233_v11 }
 0x225   :  { %623 = vmatmul.msk.f32.vlgmr.msra.gmra.mxu3 %vm176_vm1, %v716_v12  ;;  %625 = vmatmul.msk.f32.vlgmr.msrb.gmra.mxu1 %vm176_vm1, %v716_v12 }
 0x226   :  { %717 = vpow2.f32 %v236_v13 }
 0x22c   :  { %v718_v14 = vpop.eup %717 }
 0x22d   :  { %624 = vmatmul.msk.f32.gmra.mxu3 %vm176_vm1, %v718_v14  ;;  %626 = vmatmul.msk.f32.gmra.mxu1 %vm176_vm1, %v718_v14 }
 0x2a2   :  { %v284_v19 = vpop.f32.mrf.mxu1 }
 0x2a3   :  { %v290_v20 = vmax.f32 %v284_v19, 1e-30 }
 0x2a5   :  { %719 = vrcp.f32 %v290_v20 }
 0x2a8   :  { %v261_v21 = vpop.f32.mrf.mxu3 }
 0x2aa   :  { %v287_v22 = vpop.f32.mrf.mxu1 }
 0x2ab   :  { %v291_v23 = vmax.f32 %v287_v22, 1e-30  ;;  %v720_v24 = vpop.eup %719  ;;  %v710_v22 = vld [vmem:[%s1040_s6 + $0x3] ss:$0 sm:$0xff] }
 0x2ac   :  { %v294_v27 = vmul.f32 %v720_v24, %v261_v21 }
 0x2ad   :  { %721 = vrcp.f32 %v291_v23 }
 0x2ae   :  { %723 = vrcp.f32 %v760_v39  ;;  %v712_v39 = vld [vmem:[%s1040_s6 + $0x4] ss:$0 sm:$0xff] }
 0x2b0   :  { %v264_v26 = vpop.f32.mrf.mxu3 }
 0x2b3   :  { %v722_v25 = vpop.eup %721 }
 0x2b4   :  { %v295_v28 = vmul.f32 %v722_v25, %v264_v26  ;;  %v724_v40 = vpop.eup %723 }
 0x2b5   :  { %v356_v41 = vmul.f32 32.0, %v724_v40  ;;  %vm360_vm2 = vweird.f32 %v724_v40 }
 0x2b6   :  { %v296_v29 = vpack.c.bf16 %v295_v28, %v294_v27  ;;  %v698_v27 = vld [vmem:[%s1038_s4 + $0x18] sm:$0xff]  ;;  %v697_v28 = vld [vmem:[%s1038_s4 + $0x10] sm:$0xff] }
 0x2b7   :  { %v357_v42 = vsub.f32 1.0, %v356_v41  ;;  %513 = vmatpush.bf16.msrb.mxu0 %v698_v27 }
 0x2b8   :  { %643 = vmatmul.msk.bf16.vlgmr.msra.gmra.mxu1 %vm176_vm1, %v296_v29  ;;  %v696_v29 = vld [vmem:[%s1038_s4 + $0x8] sm:$0xff] }
 0x2b9   :  { %v358_v43 = vmul.f32 %v724_v40, %v357_v42 }
 0x2bb   :  { %v359_v44 = vadd.f32 %v724_v40, %v358_v43  ;;  %514 = vmatpush.bf16.msrb.mxu0 %v697_v28 }
 0x2bd   :  { %v964_v45 = vsel %vm360_vm2, %v724_v40, %v359_v44 }
 0x2bf   :  { %515 = vmatpush.bf16.msrb.mxu0 %v696_v29 }
 0x335   :  { %v342_v31 = vpop.f32.mrf.mxu1 }
 0x336   :  { %v343_v32 = vadd.f32 %v708_v30, %v342_v31 }
 0x338   :  { %v347_v33 = vadd.f32 %v343_v32, %v831_v8  ;;  %v711_v32 = vld [vmem:[%s1040_s6] ss:$0 sm:$0xff] }
 0x33a   :  { %v349_v34 = vsel %vm72_vm0, %v347_v33, 0.0 }
 0x33b   :  { %350 = vadd.xlane.f32.xlu0 %v349_v34 }
 0x33d   :  { %v344_v35 = vpop.f32.mrf.mxu1 }
 0x33e   :  { %v345_v36 = vadd.f32 %v708_v30, %v344_v35  ;;  %v695_v30 = vld [vmem:[%s1038_s4] sm:$0xff] }
 0x33f   :  { %516 = vmatpush.bf16.msrb.mxu0 %v695_v30 }
 0x340   :  { %v348_v37 = vadd.f32 %v345_v36, %v836_v9 }
 0x342   :  { %v352_v38 = vsel %vm72_vm0, %v348_v37, 0.0 }
 0x343   :  { %353 = vadd.xlane.f32.xlu2 %v352_v38 }
 0x3ae   :  { %v351_v8 = vpop.xlane.xlu0 %350 }
 0x3af   :  { %v362_v46 = vmul.f32 %v964_v45, %v351_v8 }
 0x3b1   :  { %v364_v47 = vsub.f32 %v347_v33, %v362_v46 }
 0x3b3   :  { %v366_v48 = vmul.f32 %v364_v47, %v364_v47 }
 0x3b5   :  { %v368_v9 = vsel %vm72_vm0, %v366_v48, 0.0 }
 0x3b6   :  { %v354_v49 = vpop.xlane.xlu2 %353  ;;  %369 = vadd.xlane.f32.xlu1 %v368_v9 }
 0x3b7   :  { %v363_v50 = vmul.f32 %v964_v45, %v354_v49 }
 0x3b9   :  { %v365_v51 = vsub.f32 %v348_v37, %v363_v50 }
 0x3bb   :  { %v367_v52 = vmul.f32 %v365_v51, %v365_v51 }
 0x3bd   :  { %v371_v53 = vsel %vm72_vm0, %v367_v52, 0.0 }
 0x3be   :  { %372 = vadd.xlane.f32.xlu2 %v371_v53 }
 0x429   :  { %v370_v55 = vpop.xlane.xlu1 %369 }
 0x42a   :  { %v374_v56 = vmul.f32 %v370_v55, %v964_v45 }
 0x42c   :  { %v376_v58 = vadd.f32 1e-05, %v374_v56 }
 0x42e   :  { %725 = vrsqrt.f32 %v376_v58  ;;  %vm384_vm4 = vweird.f32 %v376_v58 }
 0x431   :  { %v373_v60 = vpop.xlane.xlu2 %372 }
 0x432   :  { %v375_v61 = vmul.f32 %v373_v60, %v964_v45 }
 0x434   :  { %v726_v63 = vpop.eup %725  ;;  %v377_v0 = vadd.f32 1e-05, %v375_v61 }
 0x435   :  { %v379_v1 = vmul.f32 %v726_v63, %v376_v58  ;;  %vm385_vm3 = vweird.f32 %v726_v63 }
 0x436   :  { %727 = vrsqrt.f32 %v377_v0  ;;  %vm386_vm5 = vmor %vm384_vm4, %vm385_vm3  ;;  %vm394_vm7 = vweird.f32 %v377_v0 }
 0x437   :  { %v380_v3 = vmul.f32 %v726_v63, %v379_v1 }
 0x439   :  { %v381_v4 = vmul.f32 0.5, %v380_v3 }
 0x43b   :  { %v382_v6 = vsub.f32 1.5, %v381_v4 }
 0x43c   :  { %v728_v7 = vpop.eup %727 }
 0x43d   :  { %v383_v10 = vmul.f32 %v726_v63, %v382_v6  ;;  %v389_v11 = vmul.f32 %v728_v7, %v377_v0  ;;  %vm395_vm6 = vweird.f32 %v728_v7 }
 0x43e   :  { %vm396_vm8 = vmor %vm394_vm7, %vm395_vm6 }
 0x43f   :  { %v390_v12 = vmul.f32 %v728_v7, %v389_v11  ;;  %v387_v13 = vsel %vm386_vm5, %v726_v63, %v383_v10 }
 0x440   :  { %v398_v16 = vmul.f32 %v387_v13, %v364_v47 }
 0x441   :  { %v391_v14 = vmul.f32 0.5, %v390_v12  ;;  %v714_v12 = vld [vmem:[%s1040_s6 + $0x6] ss:$0 sm:$0xff] }
 0x442   :  { %v401_v21 = vmul.f32 %v709_v17, %v398_v16 }
 0x443   :  { %v392_v15 = vsub.f32 1.5, %v391_v14 }
 0x444   :  { %v404_v24 = vadd.f32 %v710_v22, %v401_v21 }
 0x445   :  { %v393_v18 = vmul.f32 %v728_v7, %v392_v15 }
 0x447   :  { %v397_v19 = vsel %vm396_vm8, %v728_v7, %v393_v18  ;;  %v713_v7 = vld [vmem:[%s1040_s6 + $0x5] ss:$0 sm:$0xff]  ;;  %s762_s6 = smov 128  }
 0x448   :  { %v399_v20 = vmul.f32 %v397_v19, %v365_v51 }
 0x44a   :  { %v402_v23 = vmul.f32 %v709_v17, %v399_v20 }
 0x44c   :  { %v405_v25 = vadd.f32 %v710_v22, %v402_v23 }
 0x44e   :  { %v406_v26 = vpack.c.bf16 %v405_v25, %v404_v24 }
 0x450   :  { %652 = vmatmul.msk.bf16.vlgmr.msrb.gmra.mxu3 %vm72_vm0, %v406_v26 }
 0x4d3   :  { %v436_v31 = vpop.f32.mrf.mxu3 }
 0x4d4   :  { %v437_v33 = vadd.f32 %v711_v32, %v436_v31 }
 0x4d6   :  { %v441_v36 = vmax.f32 %v437_v33, 0.0 }
 0x4db   :  { %v438_v34 = vpop.f32.mrf.mxu3 }
 0x4dc   :  { %v439_v35 = vadd.f32 %v711_v32, %v438_v34 }
 0x4de   :  { %v442_v37 = vmax.f32 %v439_v35, 0.0 }
 0x4e0   :  { %v443_v38 = vpack.c.bf16 %v442_v37, %v441_v36 }
 0x4e2   :  { %517 = vmatmul.bf16.vlgmr.msrb.gmra.mxu0 %v443_v38 }
 0x55f   :  { %v518_v40 = vpop.f32.mrf.mxu0 }
 0x560   :  { %v519_v41 = vadd.f32 %v712_v39, %v518_v40 }
 0x562   :  { %v523_v42 = vadd.f32 %v519_v41, %v404_v24 }
 0x564   :  { %v525_v43 = vsel %vm72_vm0, %v523_v42, 0.0 }
 0x565   :  { %526 = vadd.xlane.f32.xlu0 %v525_v43 }
 0x567   :  { %v520_v44 = vpop.f32.mrf.mxu0 }
 0x568   :  { %v521_v8 = vadd.f32 %v712_v39, %v520_v44 }
 0x56a   :  { %v524_v46 = vadd.f32 %v521_v8, %v405_v25 }
 0x56c   :  { %v528_v47 = vsel %vm72_vm0, %v524_v46, 0.0 }
 0x56d   :  { %529 = vadd.xlane.f32.xlu1 %v528_v47 }
 0x5d8   :  { %v527_v48 = vpop.xlane.xlu0 %526 }
 0x5d9   :  { %v531_v9 = vmul.f32 %v527_v48, %v964_v45 }
 0x5db   :  { %v533_v49 = vsub.f32 %v523_v42, %v531_v9 }
 0x5dd   :  { %v535_v50 = vmul.f32 %v533_v49, %v533_v49 }
 0x5df   :  { %v537_v51 = vsel %vm72_vm0, %v535_v50, 0.0 }
 0x5e0   :  { %v530_v52 = vpop.xlane.xlu1 %529  ;;  %538 = vadd.xlane.f32.xlu2 %v537_v51 }
 0x5e1   :  { %v532_v53 = vmul.f32 %v530_v52, %v964_v45 }
 0x5e3   :  { %v534_v54 = vsub.f32 %v524_v46, %v532_v53 }
 0x5e5   :  { %v536_v55 = vmul.f32 %v534_v54, %v534_v54 }
 0x5e7   :  { %v540_v56 = vsel %vm72_vm0, %v536_v55, 0.0 }
 0x5e8   :  { %541 = vadd.xlane.f32.xlu0 %v540_v56 }
 0x653   :  { %v539_v57 = vpop.xlane.xlu2 %538 }
 0x654   :  { %v543_v58 = vmul.f32 %v539_v57, %v964_v45 }
 0x656   :  { %v545_v59 = vadd.f32 1e-05, %v543_v58 }
 0x658   :  { %729 = vrsqrt.f32 %v545_v59  ;;  %vm553_vm10 = vweird.f32 %v545_v59 }
 0x65b   :  { %v542_v60 = vpop.xlane.xlu0 %541 }
 0x65c   :  { %v544_v61 = vmul.f32 %v542_v60, %v964_v45 }
 0x65e   :  { %v730_v62 = vpop.eup %729  ;;  %v546_v63 = vadd.f32 1e-05, %v544_v61 }
 0x65f   :  { %v548_v0 = vmul.f32 %v730_v62, %v545_v59  ;;  %vm554_vm9 = vweird.f32 %v730_v62 }
 0x660   :  { %731 = vrsqrt.f32 %v546_v63  ;;  %vm555_vm11 = vmor %vm553_vm10, %vm554_vm9  ;;  %vm563_vm13 = vweird.f32 %v546_v63 }
 0x661   :  { %v549_v1 = vmul.f32 %v730_v62, %v548_v0 }
 0x663   :  { %v550_v2 = vmul.f32 0.5, %v549_v1 }
 0x665   :  { %v551_v3 = vsub.f32 1.5, %v550_v2 }
 0x666   :  { %v732_v4 = vpop.eup %731 }
 0x667   :  { %v552_v5 = vmul.f32 %v730_v62, %v551_v3  ;;  %v558_v6 = vmul.f32 %v732_v4, %v546_v63  ;;  %vm564_vm12 = vweird.f32 %v732_v4 }
 0x668   :  { %vm565_vm14 = vmor %vm563_vm13, %vm564_vm12 }
 0x669   :  { %v556_v10 = vsel %vm555_vm11, %v730_v62, %v552_v5  ;;  %v559_v11 = vmul.f32 %v732_v4, %v558_v6 }
 0x66a   :  { %v567_v45 = vmul.f32 %v556_v10, %v533_v49 }
 0x66b   :  { %v560_v13 = vmul.f32 0.5, %v559_v11 }
 0x66c   :  { %v570_v14 = vmul.f32 %v713_v7, %v567_v45 }
 0x66d   :  { %v561_v15 = vsub.f32 1.5, %v560_v13 }
 0x66e   :  { %v573_v16 = vadd.f32 %v714_v12, %v570_v14 }
 0x66f   :  { %v562_v17 = vmul.f32 %v732_v4, %v561_v15 }
 0x670   :  { %575 = vst.msk [vmem:[#allocation2] sm:$0xff] %vm72_vm0, %v573_v16 }
 0x671   :  { %v566_v18 = vsel %vm565_vm14, %v732_v4, %v562_v17 }
 0x672   :  { %v568_v19 = vmul.f32 %v566_v18, %v534_v54 }
 0x674   :  { %v571_v20 = vmul.f32 %v713_v7, %v568_v19 }
 0x676   :  { %v574_v21 = vadd.f32 %v714_v12, %v571_v20 }
 0x678   :  { %576 = vst.msk [vmem:[#allocation2 + $0x8] sm:$0xff] %vm72_vm0, %v574_v21 }
 0x679   :  { %589 = dma.vmem_to_hbm [thread:$0]  %s582_s28, 256, %s584_s9, [#allocation3], %s762_s6, %s762_s6, %s763_s3  }
 0x67a   :  { %757 = dma.done.wait [#allocation3], 256  }
 0x67b   :  { %758 = vsyncadd [#allocation3], 4294967040 }
 0x67c   :  { %594 = vsyncpa [#allocation3], 1 }

</bundles_post_ra>
